<compile_context>
chip_gen: v6e
topology: v6e:2x2x1
jax: 0.10.0
libtpu: 0.0.40
codegen_flags: <defaults>
</compile_context>

<pallas_src>
import functools

import jax
import jax.numpy as jnp
import numpy as np
from jax import lax
from jax.experimental import pallas as pl
from jax.experimental.pallas import tpu as pltpu


# ----------------------------------------------------------------------------
# helpers
# ----------------------------------------------------------------------------
def _round_up(x, m):
    return (x + m - 1) // m * m


def _pad_gate_cols(w, H, Hp):
    """(..., 4H) -> (..., 4Hp): pad each i/f/g/o column block to Hp lanes."""
    parts = []
    for k in range(4):
        blk = w[..., k * H:(k + 1) * H]
        pad = [(0, 0)] * (blk.ndim - 1) + [(0, Hp - H)]
        parts.append(jnp.pad(blk, pad))
    return jnp.concatenate(parts, axis=-1)


# ----------------------------------------------------------------------------
# kind = 'fc':  Flatten + Linear  ->  tiled (N, K) matmul, bf16 weight stream,
# f32 accumulation directly into the K-resident output block.
# ----------------------------------------------------------------------------
def _fc_kernel(x_ref, w_ref, b_ref, o_ref):
    k = pl.program_id(1)

    @pl.when(k == 0)
    def _():
        o_ref[...] = jnp.zeros_like(o_ref)

    # Output block index (0, j) is invariant along k -> o_ref is the accumulator.
    o_ref[...] += jnp.dot(x_ref[...], w_ref[...],
                          preferred_element_type=jnp.float32)

    @pl.when(k == pl.num_programs(1) - 1)
    def _():
        o_ref[...] += b_ref[...]


def fc_tiling(D, F, *, max_tk=512, max_tn=512):
    """Pad K/N UP to a multiple of the target tile (no tile shrinking).

    On v7x (3.2 TB/s HBM) max_tk/max_tn can be raised to 1024; 512 is safe on
    all generations within the default scoped-VMEM budgets.
    """
    Dp, Fp = _round_up(D, 128), _round_up(F, 128)
    tk, tn = min(max_tk, Dp), min(max_tn, Fp)
    return _round_up(Dp, tk), _round_up(Fp, tn), tk, tn


def fc_embed(x, w_p, b_p, out_feats, tk, tn):
    """x: (B, C, T); w_p: (Dp, Fp) bf16 pre-padded; b_p: (1, Fp) f32."""
    B = x.shape[0]
    Dp, Fp = w_p.shape
    x2 = x.reshape(B, -1)                                # nn.Flatten
    # x is tiny (B rows); padding/casting it per call is negligible vs W.
    x2p = jnp.pad(x2, ((0, 0), (0, Dp - x2.shape[1]))).astype(jnp.bfloat16)

    out = pl.pallas_call(
        _fc_kernel,
        out_shape=jax.ShapeDtypeStruct((B, Fp), jnp.float32),
        grid_spec=pltpu.PrefetchScalarGridSpec(
            num_scalar_prefetch=0,
            grid=(Fp // tn, Dp // tk),                   # N tiles, K innermost
            in_specs=[
                pl.BlockSpec((B, tk), lambda j, k: (0, k)),
                pl.BlockSpec((tk, tn), lambda j, k: (k, j)),
                pl.BlockSpec((1, tn), lambda j, k: (0, j)),
            ],
            out_specs=pl.BlockSpec((B, tn), lambda j, k: (0, j)),
        ),
        compiler_params=pltpu.CompilerParams(
            dimension_semantics=("parallel", "arbitrary")),
    )(x2p, w_p, b_p)
    return out[:, :out_feats]


# ----------------------------------------------------------------------------
# kind = 'lstm':  input projection hoisted outside; chunked, batch-parallel
# recurrence with h/c carried in VMEM scratch.
# ----------------------------------------------------------------------------
def _lstm_kernel(gx_ref, whh_ref, o_ref, h_ref, c_ref, *,
                 seq_len, chunk, unroll, need_mask):
    t_blk = pl.program_id(1)

    @pl.when(t_blk == 0)
    def _():
        h_ref[...] = jnp.zeros_like(h_ref)               # h0 = 0
        c_ref[...] = jnp.zeros_like(c_ref)               # c0 = 0

    Hp = h_ref.shape[-1]
    whh = whh_ref[...]                                    # resident (Hp, 4Hp)
    base = t_blk * chunk

    def step(t, carry):
        h, c = carry
        # gx already holds x_t @ W_ih + (b_ih + b_hh)  (hoisted outside).
        gates = gx_ref[t] + jnp.dot(h, whh, preferred_element_type=jnp.float32)
        # lane-aligned static gate views (Hp multiple of 128); order i,f,g,o
        i_g = jax.nn.sigmoid(gates[:, 0 * Hp:1 * Hp])
        f_g = jax.nn.sigmoid(gates[:, 1 * Hp:2 * Hp])
        g_g = jnp.tanh(gates[:, 2 * Hp:3 * Hp])
        o_g = jax.nn.sigmoid(gates[:, 3 * Hp:4 * Hp])
        c_new = f_g * c + i_g * g_g
        h_new = o_g * jnp.tanh(c_new)
        if need_mask:                                     # zero-padded timesteps
            valid = (base + t) < seq_len                  # keep state unchanged
            h_new = jnp.where(valid, h_new, h)
            c_new = jnp.where(valid, c_new, c)
        return (h_new, c_new)

    h, c = lax.fori_loop(0, chunk, step, (h_ref[...], c_ref[...]),
                         unroll=unroll)                   # bounded unroll
    h_ref[...] = h
    c_ref[...] = c

    @pl.when(t_blk == pl.num_programs(1) - 1)
    def _():
        o_ref[...] = h.astype(o_ref.dtype)                # lstm_out[:, -1]


def lstm_embed(x, w_ih_p, w_hh_p, b_p, out_feats, *,
               chunk_budget_bytes=4 << 20, max_batch_tile=64):
    """x: (B, C, T); gate-padded weights (C,4Hp)/(Hp,4Hp)/(4Hp,) -> (B, out_feats)."""
    B, C, T = x.shape
    Hp4 = w_ih_p.shape[-1]
    Hp = Hp4 // 4

    # Hoisted input projection: one big MXU matmul over all T timesteps; the
    # (B,C,T)->(T,B,.) layout change and the bias add are folded in for free.
    # TODO(synk): on v6e/v7x stream gx (and the h@W_hh operands) in bf16 with
    # f32 accumulation to halve HBM traffic / double the time chunk.
    gx = jnp.einsum('bct,cg->tbg', x, w_ih_p,
                    preferred_element_type=jnp.float32) + b_p     # (T, B, 4Hp)

    # Batch tiles ("parallel" -> shards across TensorCores on v7x).
    Bp = _round_up(B, 8)
    Bt = Bp if Bp <= max_batch_tile else max_batch_tile
    Bp = _round_up(Bp, Bt)

    # Time chunks: 2 pipeline buffers x (Tc x Bt x 4Hp x 4B) <= chunk budget.
    Tc = int(max(1, min(T, chunk_budget_bytes // (2 * Bt * Hp4 * 4))))
    Tp = _round_up(T, Tc)
    unroll = 8 if Tc % 8 == 0 else 4 if Tc % 4 == 0 else 2 if Tc % 2 == 0 else 1

    # Zero-pad batch and time; padded batch rows provably keep h = c = 0 and
    # padded timesteps are masked out inside the kernel.
    gx = jnp.pad(gx, ((0, Tp - T), (0, Bp - B), (0, 0)))

    # Explicit scoped-VMEM limit: gx chunk (x2 bufs) + w_hh (x2) + out + h/c.
    need = (2 * Tc * Bt * Hp4 + 2 * Hp * Hp4 + 2 * Bt * Hp + 2 * Bt * Hp) * 4
    vmem_limit = int(min(max(2 * need, 16 << 20), 64 << 20))

    kernel = functools.partial(_lstm_kernel, seq_len=T, chunk=Tc,
                               unroll=unroll, need_mask=(Tp != T))
    out = pl.pallas_call(
        kernel,
        out_shape=jax.ShapeDtypeStruct((Bp, Hp), jnp.float32),
        grid_spec=pltpu.PrefetchScalarGridSpec(
            num_scalar_prefetch=0,
            grid=(Bp // Bt, Tp // Tc),          # (batch tiles, time chunks)
            in_specs=[
                pl.BlockSpec((Tc, Bt, Hp4), lambda b, t: (t, b, 0)),
                # Constant index map -> fetched once per batch tile; for very
                # large H on v7x, pl.Buffered(1) here would also drop the
                # redundant second VMEM buffer of this resident weight.
                pl.BlockSpec((Hp, Hp4), lambda b, t: (0, 0)),
            ],
            out_specs=pl.BlockSpec((Bt, Hp), lambda b, t: (b, 0)),
            scratch_shapes=[pltpu.VMEM((Bt, Hp), jnp.float32),    # h carry
                            pltpu.VMEM((Bt, Hp), jnp.float32)],   # c carry
        ),
        compiler_params=pltpu.CompilerParams(
            dimension_semantics=("parallel", "arbitrary"),
            vmem_limit_bytes=vmem_limit),
    )(gx, w_hh_p)
    return out[:B, :out_feats]                  # drop padded batch/hidden lanes


# ----------------------------------------------------------------------------
# Module wrapper mirroring TimeDelayEmbeddingModule
# ----------------------------------------------------------------------------
class TimeDelayEmbedding:
    def __init__(self, kind, out_feats, in_channels, seq_len, key):
        self.kind = kind
        self.out_feats = out_feats
        k1, k2, k3, k4 = jax.random.split(key, 4)
        if kind == "fc":
            D = in_channels * seq_len
            bound = 1.0 / np.sqrt(D)
            # LazyLinear weight (out_feats, D); stored transposed (D, out_feats).
            self.w = jax.random.uniform(k1, (D, out_feats), jnp.float32, -bound, bound)
            self.b = jax.random.uniform(k2, (out_feats,), jnp.float32, -bound, bound)
            # Pre-padded, bf16 copy streamed by the kernel (padded ONCE here,
            # never re-padded per forward); bias stays f32 (added post-accum).
            Dp, Fp, tk, tn = fc_tiling(D, out_feats)
            self._tk, self._tn = tk, tn
            self._w_p = jnp.pad(self.w, ((0, Dp - D), (0, Fp - out_feats))
                                ).astype(jnp.bfloat16)
            self._b_p = jnp.pad(self.b, (0, Fp - out_feats)).reshape(1, Fp)
        elif kind == "lstm":
            H = out_feats
            bound = 1.0 / np.sqrt(H)
            # PyTorch LSTM params (gate order i,f,g,o), stored transposed.
            self.w_ih = jax.random.uniform(k1, (in_channels, 4 * H), jnp.float32, -bound, bound)
            self.w_hh = jax.random.uniform(k2, (H, 4 * H), jnp.float32, -bound, bound)
            b_ih = jax.random.uniform(k3, (4 * H,), jnp.float32, -bound, bound)
            b_hh = jax.random.uniform(k4, (4 * H,), jnp.float32, -bound, bound)
            self.b = b_ih + b_hh
            # Lane-aligned gate-block layout: each i/f/g/o block padded to
            # Hp = round_up(H, 128) lanes; w_hh rows padded to Hp.
            Hp = _round_up(H, 128)
            self._w_ih_p = _pad_gate_cols(self.w_ih, H, Hp)                  # (C, 4Hp)
            self._w_hh_p = jnp.pad(_pad_gate_cols(self.w_hh, H, Hp),
                                   ((0, Hp - H), (0, 0)))                    # (Hp, 4Hp)
            self._b_p = _pad_gate_cols(self.b, H, Hp)                        # (4Hp,)
        else:
            raise ValueError("Invalid kind:", kind)

    def __call__(self, x):
        if self.kind == "fc":
            return fc_embed(x, self._w_p, self._b_p, self.out_feats,
                            self._tk, self._tn)
        return lstm_embed(x, self._w_ih_p, self._w_hh_p, self._b_p,
                          self.out_feats)


# ----------------------------------------------------------------------------
# Pure-JAX references for verification
# ----------------------------------------------------------------------------
def fc_ref(x, w, b):
    # Matches the kernel's deliberate bf16 quantization of x/W (f32 accumulate).
    xq = x.reshape(x.shape[0], -1).astype(jnp.bfloat16).astype(jnp.float32)
    wq = w.astype(jnp.bfloat16).astype(jnp.float32)
    return xq @ wq + b


def lstm_ref(x, w_ih, w_hh, b):
    B, _, T = x.shape
    H = w_hh.shape[0]
    x_tbc = jnp.transpose(x, (2, 0, 1))                  # (T, B, C)

    def step(carry, x_t):
        h, c = carry
        gates = x_t @ w_ih + h @ w_hh + b
        i = jax.nn.sigmoid(gates[:, 0 * H:1 * H])
        f = jax.nn.sigmoid(gates[:, 1 * H:2 * H])
        g = jnp.tanh(gates[:, 2 * H:3 * H])
        o = jax.nn.sigmoid(gates[:, 3 * H:4 * H])
        c_new = f * c + i * g
        h_new = o * jnp.tanh(c_new)
        return (h_new, c_new), h_new

    init = (jnp.zeros((B, H), jnp.float32), jnp.zeros((B, H), jnp.float32))
    (h_last, _), _ = lax.scan(step, init, x_tbc)
    return h_last


if __name__ == "__main__":
    key = jax.random.PRNGKey(0)
    kx, kf, kl = jax.random.split(key, 3)

    B, C, T, OUT = 2, 4, 8, 32
    x = jax.random.normal(kx, (B, C, T), jnp.float32)

    # kind = 'fc'
    mod_fc = TimeDelayEmbedding("fc", OUT, C, T, kf)
    y_fc = jax.block_until_ready(mod_fc(x))
    y_fc_ref = fc_ref(x, mod_fc.w, mod_fc.b)
    np.testing.assert_allclose(np.asarray(y_fc), np.asarray(y_fc_ref),
                               rtol=1e-3, atol=1e-3)

    # kind = 'lstm'
    mod_lstm = TimeDelayEmbedding("lstm", OUT, C, T, kl)
    y_lstm = jax.block_until_ready(mod_lstm(x))
    y_lstm_ref = lstm_ref(x, mod_lstm.w_ih, mod_lstm.w_hh, mod_lstm.b)
    np.testing.assert_allclose(np.asarray(y_lstm), np.asarray(y_lstm_ref),
                               rtol=1e-5, atol=1e-5)

    assert y_fc.shape == (B, OUT) and y_lstm.shape == (B, OUT)
    print("KERNEL_OK")
</pallas_src>

<mosaic_0001>
module attributes {stable_mosaic.version = 11 : i64} {
  func.func @_fc_kernel(%arg0: i32, %arg1: i32, %arg2: memref<2x128xbf16, #tpu.memory_space<vmem>>, %arg3: memref<128x128xbf16, #tpu.memory_space<vmem>>, %arg4: memref<1x128xf32, #tpu.memory_space<vmem>>, %arg5: memref<2x128xf32, #tpu.memory_space<vmem>>) attributes {dimension_semantics = [#tpu.dimension_semantics<parallel>, #tpu.dimension_semantics<arbitrary>], iteration_bounds = array<i64: 1, 1>, scalar_prefetch = 0 : i64, scratch_operands = 0 : i64, tpu.core_type = #tpu.core_type<tc>, window_params = [{transform_indices = @transform_0, window_bounds = array<i64: 2, 128>}, {transform_indices = @transform_1, window_bounds = array<i64: 128, 128>}, {transform_indices = @transform_2, window_bounds = array<i64: 1, 128>}, {transform_indices = @transform_3, window_bounds = array<i64: 2, 128>}]} {
    %c0_i32 = arith.constant 0 : i32
    %0 = arith.cmpi eq, %arg1, %c0_i32 : i32
    %1 = arith.extui %0 : i1 to i32
    %c0_i32_0 = arith.constant 0 : i32
    %2 = arith.cmpi ne, %1, %c0_i32_0 : i32
    scf.if %2 {
      %cst_10 = arith.constant 0.000000e+00 : f32
      %12 = vector.broadcast %cst_10 : f32 to vector<2x128xf32>
      %c0_11 = arith.constant 0 : index
      %c0_12 = arith.constant 0 : index
      %13 = vector.load %arg5[%c0_11, %c0_12] : memref<2x128xf32, #tpu.memory_space<vmem>>, vector<2x128xf32>
      tpu.vector_store %arg5[%c0_11, %c0_12], %12 {strides = array<i32>} : memref<2x128xf32, #tpu.memory_space<vmem>>, vector<2x128xf32>,
    } else {
    }
    %c0 = arith.constant 0 : index
    %c0_1 = arith.constant 0 : index
    %3 = vector.load %arg5[%c0, %c0_1] : memref<2x128xf32, #tpu.memory_space<vmem>>, vector<2x128xf32>
    %c0_2 = arith.constant 0 : index
    %c0_3 = arith.constant 0 : index
    %4 = vector.load %arg2[%c0_2, %c0_3] : memref<2x128xbf16, #tpu.memory_space<vmem>>, vector<2x128xbf16>
    %c0_4 = arith.constant 0 : index
    %c0_5 = arith.constant 0 : index
    %5 = vector.load %arg3[%c0_4, %c0_5] : memref<128x128xbf16, #tpu.memory_space<vmem>>, vector<128x128xbf16>
    %cst = arith.constant dense<0.000000e+00> : vector<2x128xf32>
    %6 = tpu.matmul %4, %5, %cst {dimension_numbers = #tpu.dot_dimension_numbers<[1], [0], [0], [1], [0, 0, 1, 1], [], []>} : vector<2x128xbf16>, vector<128x128xbf16>, vector<2x128xf32> -> vector<2x128xf32>
    %7 = arith.addf %3, %6 : vector<2x128xf32>
    %c0_6 = arith.constant 0 : index
    %c0_7 = arith.constant 0 : index
    %8 = vector.load %arg5[%c0_6, %c0_7] : memref<2x128xf32, #tpu.memory_space<vmem>>, vector<2x128xf32>
    tpu.vector_store %arg5[%c0_6, %c0_7], %7 {strides = array<i32>} : memref<2x128xf32, #tpu.memory_space<vmem>>, vector<2x128xf32>,
    %c0_i32_8 = arith.constant 0 : i32
    %9 = arith.cmpi eq, %arg1, %c0_i32_8 : i32
    %10 = arith.extui %9 : i1 to i32
    %c0_i32_9 = arith.constant 0 : i32
    %11 = arith.cmpi ne, %10, %c0_i32_9 : i32
    scf.if %11 {
      %c0_10 = arith.constant 0 : index
      %c0_11 = arith.constant 0 : index
      %12 = vector.load %arg5[%c0_10, %c0_11] : memref<2x128xf32, #tpu.memory_space<vmem>>, vector<2x128xf32>
      %c0_12 = arith.constant 0 : index
      %c0_13 = arith.constant 0 : index
      %13 = vector.load %arg4[%c0_12, %c0_13] : memref<1x128xf32, #tpu.memory_space<vmem>>, vector<1x128xf32>
      %14 = vector.broadcast %13 : vector<1x128xf32> to vector<2x128xf32>
      %15 = arith.addf %12, %14 : vector<2x128xf32>
      %c0_14 = arith.constant 0 : index
      %c0_15 = arith.constant 0 : index
      %16 = vector.load %arg5[%c0_14, %c0_15] : memref<2x128xf32, #tpu.memory_space<vmem>>, vector<2x128xf32>
      tpu.vector_store %arg5[%c0_14, %c0_15], %15 {strides = array<i32>} : memref<2x128xf32, #tpu.memory_space<vmem>>, vector<2x128xf32>,
    } else {
    }
    return
  }
  func.func @transform_0(%arg0: i32, %arg1: i32) -> (i32, i32) {
    %c0_i32 = arith.constant 0 : i32
    %c0_i32_0 = arith.constant 0 : i32
    return %c0_i32, %arg1 : i32, i32
  }
  func.func @transform_1(%arg0: i32, %arg1: i32) -> (i32, i32) {
    %c0_i32 = arith.constant 0 : i32
    return %arg1, %arg0 : i32, i32
  }
  func.func @transform_2(%arg0: i32, %arg1: i32) -> (i32, i32) {
    %c0_i32 = arith.constant 0 : i32
    %c0_i32_0 = arith.constant 0 : i32
    return %c0_i32, %arg0 : i32, i32
  }
  func.func @transform_3(%arg0: i32, %arg1: i32) -> (i32, i32) {
    %c0_i32 = arith.constant 0 : i32
    %c0_i32_0 = arith.constant 0 : i32
    return %c0_i32, %arg0 : i32, i32
  }
}

</mosaic_0001>

<bundles_post_ra>
// kernel: tpu_custom_call.1
= control target key start
LH: loop header
LB: loop body
LE: loop exit
PB: predicated region body
PF: predicated region fallthrough
CT: control target
= control target key end

     0   :  { %8 = vsyncpa [#allocation3], 0  ;;  %s342_s0 = inlined_call_operand.hbm [shape: bf16[2,128], index: 0, kind: input, shape index: {}]   ;;  %s343_s1 = inlined_call_operand.hbm [shape: bf16[128,128], index: 1, kind: input, shape index: {}]   ;;  %s344_s2 = inlined_call_operand.vmem [shape: f32[1,128], index: 2, kind: input, shape index: {}]   ;;  %s345_s3 = inlined_call_operand.hbm [shape: f32[2,128], index: 3, kind: output, shape index: {}]  }
   0x1   :  { %9 = vsyncpa [#allocation6], 0 }
   0x2   :  { %10 = vsyncpa [#allocation4], 0  ;;  %s303_s12 = smov [#allocation2]   ;;  %s304_s14 = smov [#allocation5]  }
   0x3   :  { %s17_s13 = sshll.u32 %s303_s12, 4  ;;  %s26_s15 = sshll.u32 %s304_s14, 4  ;;  %s18_s13 = int_to_ptr.vmem [resolvable:$true] %s17_s13  ;;  %s27_s15 = int_to_ptr.vmem [resolvable:$true] %s26_s15 }
   0x4   :  { %s245_s16 = scalar_lea.vmem %s18_s13, 16  ;;  %s249_s17 = scalar_lea.vmem %s18_s13, 32 }
   0x5   :  { %p246_p0 = scmp.ne.s32.totalorder %s18_s13, %s245_s16  ;;  %p250_p1 = scmp.lt.s32.totalorder %s18_s13, %s18_s13 }
   0x6   :  { %p251_p2 = scmp.lt.s32.totalorder %s249_s17, %s245_s16 }
   0x8   :  { %p252_p3 = por %p251_p2, %p250_p1 }
   0xa   :  { %p253_p4 = pnand %p252_p3, %p246_p0 }
   0xc   :  { %256 = shalt.err (!%p253_p4)
}
   0xd   :  { %20 = dma.hbm_to_vmem [thread:$0]  %s342_s0, 16, %s18_s13, [#allocation3]  }
   0xe   :  { %s265_s20 = scalar_lea.vmem %s27_s15, 1024  ;;  %p270_p6 = scmp.lt.s32.totalorder %s27_s15, %s27_s15 }
   0xf   :  { %p266_p5 = scmp.ne.s32.totalorder %s27_s15, %s265_s20  ;;  %p271_p7 = scmp.lt.s32.totalorder %s265_s20, %s265_s20 }
  0x11   :  { %p272_p8 = por %p271_p7, %p270_p6 }
  0x13   :  { %p273_p9 = pnand %p272_p8, %p266_p5 }
  0x15   :  { %276 = shalt.err (!%p273_p9)
}
  0x16   :  { %s305_s21 = smov 64   ;;  %s306_s22 = smov 4  }
  0x17   :  { %32 = dma.hbm_to_vmem [thread:$0]  %s343_s1, 1024, %s27_s15, [#allocation6], %s305_s21, %s305_s21, %s306_s22  }
  0x18   :  { %297 = dma.done.wait [#allocation3], 16  }
  0x19   :  { %298 = vsyncadd [#allocation3], 4294967280 }
  0x1a   :  { %299 = dma.done.wait [#allocation6], 1024  }
  0x1b   :  { %300 = vsyncadd [#allocation6], 4294966272  ;;  %v307_v0 = vmov 0.0   ;;  %vm308_vm0 = vmmov 0   ;;  %v229_v1 = vld [vmem:[#allocation5 + $0x38] sm:$0xff]   ;;  %v230_v2 = vld [vmem:[#allocation5 + $0x30] sm:$0xff]  }
  0x1c   :  { %202 = vmatprep.subr.bf16.mxu0 %v307_v0  ;;  %46 = vst [vmem:[#allocation7] sm:$0x3] %v307_v0  ;;  %218 = vmatprep.mubr.msk.bf16.mxu0 %vm308_vm0, %v307_v0  ;;  %v231_v3 = vld [vmem:[#allocation5 + $0x28] sm:$0xff]   ;;  %v232_v4 = vld [vmem:[#allocation5 + $0x20] sm:$0xff]   ;;  %v233_v5 = vld [vmem:[#allocation5 + $0x18] sm:$0xff]   ;;  %s309_s25 = smov [#allocation7]  }
  0x1d   :  { %203 = vmatpush3.bf16.msra.mxu0 %v229_v1  ;;  %v234_v6 = vld [vmem:[#allocation5 + $0x10] sm:$0xff]   ;;  %v235_v7 = vld [vmem:[#allocation5 + $0x8] sm:$0xff]   ;;  %v236_v8 = vld [vmem:[#allocation5] sm:$0xff]   ;;  %s174_s26 = sshll.u32 %s309_s25, 4  ;;  %s175_s26 = int_to_ptr.vmem [resolvable:$true] %s174_s26 }
  0x1e   :  { %204 = vmatprep.subr.bf16.mxu0 %v307_v0  ;;  %v48_v9 = vld [vmem:[#allocation2] sm:$0x1]  ;;  %s277_s27 = scalar_lea.vmem %s175_s26, 32  ;;  %p282_p11 = scmp.lt.s32.totalorder %s175_s26, %s175_s26 }
  0x1f   :  { %v192_v16 = vld [vmem:[%s344_s2] ss:$0 sm:$0xff]  ;;  %p278_p10 = scmp.ne.s32.totalorder %s175_s26, %s277_s27  ;;  %p283_p12 = scmp.lt.s32.totalorder %s277_s27, %s277_s27 }
  0x21   :  { %205 = vmatpush3.bf16.msra.mxu0 %v230_v2  ;;  %p284_p13 = por %p283_p12, %p282_p11 }
  0x22   :  { %206 = vmatprep.subr.bf16.mxu0 %v307_v0 }
  0x23   :  { %v47_v10 = vld [vmem:[#allocation7] sm:$0x3]  ;;  %p285_p0 = pnand %p284_p13, %p278_p10 }
  0x25   :  { %207 = vmatpush3.bf16.msra.mxu0 %v231_v3 }
  0x26   :  { %208 = vmatprep.subr.bf16.mxu0 %v307_v0 }
  0x29   :  { %209 = vmatpush3.bf16.msra.mxu0 %v232_v4 }
  0x2a   :  { %210 = vmatprep.subr.bf16.mxu0 %v307_v0 }
  0x2d   :  { %211 = vmatpush3.bf16.msra.mxu0 %v233_v5 }
  0x2e   :  { %212 = vmatprep.subr.bf16.mxu0 %v307_v0 }
  0x31   :  { %213 = vmatpush3.bf16.msra.mxu0 %v234_v6 }
  0x32   :  { %214 = vmatprep.subr.bf16.mxu0 %v307_v0 }
  0x35   :  { %215 = vmatpush3.bf16.msra.mxu0 %v235_v7 }
  0x36   :  { %216 = vmatprep.subr.bf16.mxu0 %v307_v0 }
  0x39   :  { %217 = vmatpush3.bf16.msra.mxu0 %v236_v8 }
  0x3c   :  { %219 = vmatmul.mubr.bf16.vlgmr.msra.gmra.mxu0 %v48_v9 }
  0xfc   :  { %v147_v11 = vpop.f32.mrf.mxu0 }
  0xfd   :  { %v153_v12 = vadd.f32 %v147_v11, %v47_v10 }
  0xfe   :  { %v220_v13 = vpop.f32.mrf.mxu0 }
  0xff   :  { %154 = vst [vmem:[#allocation7] sm:$0x3] %v153_v12 }
 0x100   :  { %v150_v14 = vpop.f32.mrf.mxu0 }
 0x102   :  { %v221_v15 = vpop.f32.mrf.mxu0 }
 0x106   :  { %v158_v17 = vld [vmem:[#allocation7] sm:$0x3] }
 0x107   :  { %v166_v18 = vadd.f32 %v192_v16, %v158_v17 }
 0x109   :  { %167 = vst [vmem:[#allocation7] sm:$0x3] %v166_v18 }
 0x10a   :  { %288 = shalt.err (!%p285_p0)
}
 0x10b   :  { %177 = dma.vmem_to_hbm [thread:$0]  %s175_s26, 32, %s345_s3, [#allocation4]  }
 0x10c   :  { %301 = dma.done.wait [#allocation4], 32  }
 0x10d   :  { %302 = vsyncadd [#allocation4], 4294967264 }
 0x10e   :  { %181 = vsyncpa [#allocation3], 1 }
 0x10f   :  { %182 = vsyncpa [#allocation6], 1 }
 0x110   :  { %183 = vsyncpa [#allocation4], 1 }

</bundles_post_ra>
